<compile_context>
chip_gen: v5e
topology: v5e:2x2
jax: 0.10.0
libtpu: 0.0.40
codegen_flags: <defaults>
</compile_context>

<pallas_src>
import functools

import jax
import jax.numpy as jnp
from jax.experimental import pallas as pl
from jax.experimental.pallas import tpu as pltpu


def _round_up(x, m):
    return ((x + m - 1) // m) * m


# ---------------------------------------------------------------------------
# Kernel
# ---------------------------------------------------------------------------
def lstm_chunk_kernel(x_ref, h0_ref, c0_ref, w_ref, h_seq_ref, c_seq_ref,
                      xh_scr, c_scr, *, tc, in_pad, n_pad):
    """Process `tc` timesteps of the recurrence for one batch block.

    xh_scr : (Bb, in_pad + n_pad) compute-dtype scratch holding [x_t | h_{t-1}]
    c_scr  : (Bb, n_pad) f32 carried cell state
    """
    t_chunk = pl.program_id(1)

    # (Re-)initialize the carried state from h0/c0 at the first time chunk of
    # each batch block (batch is the outer, "parallel" grid axis).
    @pl.when(t_chunk == 0)
    def _():
        xh_scr[:, in_pad:] = h0_ref[...].astype(xh_scr.dtype)
        c_scr[...] = c0_ref[...]

    def step(t, carry):
        # Stage x_t into the head lanes of the stacked [x | h] operand.
        xh_scr[:, :in_pad] = x_ref[t]

        # One fused matmul: (Bb, in_pad+Np) @ (in_pad+Np, 4*Np), f32 accum.
        z = jnp.dot(xh_scr[...], w_ref[...],
                    preferred_element_type=jnp.float32)

        # Static, 128-aligned lane slices into the four gates (order i|f|g|o).
        i = jax.nn.sigmoid(z[:, 0 * n_pad:1 * n_pad])
        f = jax.nn.sigmoid(z[:, 1 * n_pad:2 * n_pad])
        g = jnp.tanh(z[:, 2 * n_pad:3 * n_pad])
        o = jax.nn.sigmoid(z[:, 3 * n_pad:4 * n_pad])

        c = c_scr[...]
        C = f * c + i * g
        H = o * jnp.tanh(C)

        c_scr[...] = C
        # Tail-lane write is both the h carry and its compute-dtype shadow.
        xh_scr[:, in_pad:] = H.astype(xh_scr.dtype)

        h_seq_ref[t] = H.astype(h_seq_ref.dtype)
        c_seq_ref[t] = C.astype(c_seq_ref.dtype)
        return carry

    jax.lax.fori_loop(0, tc, step, 0)


# ---------------------------------------------------------------------------
# Weight fusion: stacked [W_x; W_h] slab, lane/row zero-padded, gates i|f|g|o.
# ---------------------------------------------------------------------------
def _fuse_weights(params, in_features, out_features, in_pad, n_pad,
                  weight_dtype):
    def gate(wx_name, wh_name):
        wx = jnp.pad(params[wx_name],
                     ((0, in_pad - in_features), (0, n_pad - out_features)))
        wh = jnp.pad(params[wh_name],
                     ((0, n_pad - out_features), (0, n_pad - out_features)))
        return jnp.concatenate([wx, wh], axis=0)        # (in_pad+n_pad, n_pad)

    w = jnp.concatenate(
        [gate("weight_i" + g, "weight_h" + g) for g in "ifgo"], axis=1)
    return w.astype(weight_dtype)                        # (in_pad+n_pad, 4*n_pad)


# ---------------------------------------------------------------------------
# Wrapper
# ---------------------------------------------------------------------------
def lstm_layer_scan(inputs_seq, h0, c0, params, *,
                    weight_dtype=jnp.bfloat16, time_chunk=None,
                    batch_block=None, unpad=True):
    """Run the LSTM cell over a [T, B, in] sequence inside ONE pallas_call.

    Step t applies exactly the PyTorch module's forward to
    (inputs_seq[t], h_{t-1}, c_{t-1}). Returns (H_seq, C_seq), each
    [T, B, out] (or [T, B, Np] padded if unpad=False, which avoids an extra
    full-sequence HBM copy for consumers that tolerate the padded layout).

    Note: MXU M-occupancy scales with B; stacking independent sequences into
    the batch dimension is essentially free extra throughput.
    """
    T, B, in_features = inputs_seq.shape
    out_features = h0.shape[1]
    n_pad = _round_up(max(out_features, 1), 128)
    in_pad = _round_up(max(in_features, 1), 128)

    # Time chunking (amortize per-grid-step overhead).
    tc = min(T, 32) if time_chunk is None else max(1, min(time_chunk, T))
    n_t = pl.cdiv(T, tc)
    t_pad_total = n_t * tc

    # Batch blocking (leading "parallel" grid axis; 2 TCs on v7x).
    bb = B if batch_block is None else batch_block
    assert B % bb == 0 and bb % 8 == 0, "batch block must divide B and be a multiple of 8"
    n_b = B // bb

    w = _fuse_weights(params, in_features, out_features, in_pad, n_pad,
                      weight_dtype)
    h0p = jnp.pad(h0, ((0, 0), (0, n_pad - out_features))).astype(jnp.float32)
    c0p = jnp.pad(c0, ((0, 0), (0, n_pad - out_features))).astype(jnp.float32)
    # Pre-cast x to the compute dtype in the wrapper; pad T and lane dims.
    x_seq = jnp.pad(inputs_seq,
                    ((0, t_pad_total - T), (0, 0), (0, in_pad - in_features))
                    ).astype(weight_dtype)

    kernel = functools.partial(lstm_chunk_kernel, tc=tc, in_pad=in_pad,
                               n_pad=n_pad)

    in_specs = (
        # x chunk: one (tc, bb, in_pad) slab per grid step.
        pl.BlockSpec((tc, bb, in_pad), lambda b, t: (t, b, 0)),
        # h0 / c0: per-batch-block, only read at time-chunk 0.
        pl.BlockSpec((bb, n_pad), lambda b, t: (b, 0)),
        pl.BlockSpec((bb, n_pad), lambda b, t: (b, 0)),
        # Stacked weights: resident in VMEM across the whole recurrence.
        pl.BlockSpec((in_pad + n_pad, 4 * n_pad), lambda b, t: (0, 0)),
    )
    out_specs = (
        pl.BlockSpec((tc, bb, n_pad), lambda b, t: (t, b, 0)),
        pl.BlockSpec((tc, bb, n_pad), lambda b, t: (t, b, 0)),
    )
    out_shape = (
        jax.ShapeDtypeStruct((t_pad_total, B, n_pad), jnp.float32),
        jax.ShapeDtypeStruct((t_pad_total, B, n_pad), jnp.float32),
    )

    # VMEM budget: weight slab (assume possibly double-buffered) + streamed
    # x / output blocks + state + scratch, with margin; clamped so it stays
    # valid on v7x's 64 MiB physical VMEM and above v5e's 16 MiB default.
    wbytes = jnp.dtype(weight_dtype).itemsize
    est = (2 * (in_pad + n_pad) * 4 * n_pad * wbytes        # weights (x2 bufs)
           + 2 * tc * bb * in_pad * wbytes                  # x blocks
           + 2 * 2 * tc * bb * n_pad * 4                    # H/C out blocks
           + 4 * bb * n_pad * 4                             # h0/c0 blocks
           + bb * (in_pad + n_pad) * wbytes + bb * n_pad * 4)  # scratch
    vmem_limit = int(min(max(2 * est + (4 << 20), 32 << 20), 60 << 20))

    H_seq, C_seq = pl.pallas_call(
        kernel,
        grid=(n_b, n_t),
        in_specs=in_specs,
        out_specs=out_specs,
        out_shape=out_shape,
        scratch_shapes=[
            pltpu.VMEM((bb, in_pad + n_pad), weight_dtype),  # [x_t | h] operand
            pltpu.VMEM((bb, n_pad), jnp.float32),            # carried cell state
        ],
        compiler_params=pltpu.CompilerParams(
            dimension_semantics=("parallel", "arbitrary"),
            vmem_limit_bytes=vmem_limit),
    )(x_seq, h0p, c0p, w)

    H_seq = H_seq[:T]
    C_seq = C_seq[:T]
    if unpad:
        H_seq = H_seq[:, :, :out_features]
        C_seq = C_seq[:, :, :out_features]
    return H_seq, C_seq


def lstm_layer_forward(inputs, h, c, params, *, weight_dtype=jnp.float32):
    """Single-step LSTM cell, matching LSTMLayer.forward. Returns (H, C)."""
    H_seq, C_seq = lstm_layer_scan(inputs[None], h, c, params,
                                   weight_dtype=weight_dtype, time_chunk=1)
    return H_seq[0], C_seq[0]


# ---------------------------------------------------------------------------
# Params + references
# ---------------------------------------------------------------------------
def init_params(key, in_features, out_features):
    """Deterministic randn-like init, mirroring torch.randn in reset_parameters."""
    names_shapes = {
        "weight_ii": (in_features, out_features),
        "weight_hi": (out_features, out_features),
        "weight_if": (in_features, out_features),
        "weight_hf": (out_features, out_features),
        "weight_ig": (in_features, out_features),
        "weight_hg": (out_features, out_features),
        "weight_io": (in_features, out_features),
        "weight_ho": (out_features, out_features),
    }
    params = {}
    keys = jax.random.split(key, len(names_shapes))
    for k, (name, shape) in zip(keys, names_shapes.items()):
        params[name] = jax.random.normal(k, shape, dtype=jnp.float32)
    return params


def lstm_layer_reference_scan(x_seq, h0, c0, params, *,
                              compute_dtype=jnp.float32):
    """Pure-JAX reference scan. compute_dtype=bf16 matches the kernel's
    bf16-operand / f32-accumulation path; f32 matches the PyTorch forward."""
    def mm(a, w):
        return jnp.dot(a.astype(compute_dtype), w.astype(compute_dtype),
                       preferred_element_type=jnp.float32)

    h = h0.astype(jnp.float32)
    c = c0.astype(jnp.float32)
    Hs, Cs = [], []
    for t in range(x_seq.shape[0]):
        x = x_seq[t]
        i = jax.nn.sigmoid(mm(x, params["weight_ii"]) + mm(h, params["weight_hi"]))
        f = jax.nn.sigmoid(mm(x, params["weight_if"]) + mm(h, params["weight_hf"]))
        g = jnp.tanh(mm(x, params["weight_ig"]) + mm(h, params["weight_hg"]))
        o = jax.nn.sigmoid(mm(x, params["weight_io"]) + mm(h, params["weight_ho"]))
        c = f * c + i * g
        h = o * jnp.tanh(c)
        Hs.append(h)
        Cs.append(c)
    return jnp.stack(Hs), jnp.stack(Cs)


if __name__ == "__main__":
    in_features = 16
    out_features = 32

    key = jax.random.PRNGKey(0)
    k_params, k_x, k_h, k_c, k_seq, k_h2, k_c2, k_seq2 = jax.random.split(key, 8)
    params = init_params(k_params, in_features, out_features)

    # 1) Single step, f32 weights (module-equivalent path), B=8.
    B = 8
    inputs = jax.random.normal(k_x, (B, in_features), dtype=jnp.float32)
    h0 = jax.random.normal(k_h, (B, out_features), dtype=jnp.float32)
    c0 = jax.random.normal(k_c, (B, out_features), dtype=jnp.float32)
    H, C = lstm_layer_forward(inputs, h0, c0, params, weight_dtype=jnp.float32)
    jax.block_until_ready((H, C))
    H_ref, C_ref = lstm_layer_reference_scan(inputs[None], h0, c0, params)
    assert jnp.allclose(H, H_ref[0], atol=1e-4, rtol=1e-4), "H mismatch (f32)"
    assert jnp.allclose(C, C_ref[0], atol=1e-4, rtol=1e-4), "C mismatch (f32)"

    # 2) Time-chunked in-kernel recurrence, default bf16 weights, T=10, Tc=4
    #    (exercises T % Tc != 0 padding), vs the matched bf16 reference.
    T = 10
    x_seq = jax.random.normal(k_seq, (T, B, in_features), dtype=jnp.float32)
    H_seq, C_seq = lstm_layer_scan(x_seq, h0, c0, params, time_chunk=4)
    jax.block_until_ready((H_seq, C_seq))
    H_sr, C_sr = lstm_layer_reference_scan(x_seq, h0, c0, params,
                                           compute_dtype=jnp.bfloat16)
    assert jnp.allclose(H_seq, H_sr, atol=5e-3, rtol=5e-3), "H_seq mismatch (bf16)"
    assert jnp.allclose(C_seq, C_sr, atol=5e-3, rtol=5e-3), "C_seq mismatch (bf16)"

    # 3) Batch-blocked (parallel grid axis) path: B=16 split into two blocks.
    B2 = 16
    x_seq2 = jax.random.normal(k_seq2, (T, B2, in_features), dtype=jnp.float32)
    h02 = jax.random.normal(k_h2, (B2, out_features), dtype=jnp.float32)
    c02 = jax.random.normal(k_c2, (B2, out_features), dtype=jnp.float32)
    H2, C2 = lstm_layer_scan(x_seq2, h02, c02, params, batch_block=8)
    jax.block_until_ready((H2, C2))
    H2r, C2r = lstm_layer_reference_scan(x_seq2, h02, c02, params,
                                         compute_dtype=jnp.bfloat16)
    assert jnp.allclose(H2, H2r, atol=5e-3, rtol=5e-3), "H_seq mismatch (batch blocks)"
    assert jnp.allclose(C2, C2r, atol=5e-3, rtol=5e-3), "C_seq mismatch (batch blocks)"

    print("KERNEL_OK")
</pallas_src>

<mosaic_0001>
module attributes {stable_mosaic.version = 11 : i64} {
  func.func @lstm_chunk_kernel(%arg0: i32, %arg1: i32, %arg2: memref<1x8x128xf32, #tpu.memory_space<vmem>>, %arg3: memref<8x128xf32, #tpu.memory_space<vmem>>, %arg4: memref<8x128xf32, #tpu.memory_space<vmem>>, %arg5: memref<256x512xf32, #tpu.memory_space<vmem>>, %arg6: memref<1x8x128xf32, #tpu.memory_space<vmem>>, %arg7: memref<1x8x128xf32, #tpu.memory_space<vmem>>, %arg8: memref<8x256xf32, #tpu.memory_space<vmem>>, %arg9: memref<8x128xf32, #tpu.memory_space<vmem>>) attributes {dimension_semantics = [#tpu.dimension_semantics<parallel>, #tpu.dimension_semantics<arbitrary>], iteration_bounds = array<i64: 1, 1>, scalar_prefetch = 0 : i64, scratch_operands = 2 : i64, tpu.core_type = #tpu.core_type<tc>, window_params = [{transform_indices = @transform_0, window_bounds = array<i64: 1, 8, 128>}, {transform_indices = @transform_1, window_bounds = array<i64: 8, 128>}, {transform_indices = @transform_2, window_bounds = array<i64: 8, 128>}, {pipeline_mode = #tpu.pipeline_mode<synchronous>, transform_indices = @transform_3, window_bounds = array<i64: 256, 512>}, {transform_indices = @transform_4, window_bounds = array<i64: 1, 8, 128>}, {transform_indices = @transform_5, window_bounds = array<i64: 1, 8, 128>}]} {
    %c0_i32 = arith.constant 0 : i32
    %0 = arith.cmpi eq, %arg1, %c0_i32 : i32
    %1 = arith.extui %0 : i1 to i32
    %c0_i32_0 = arith.constant 0 : i32
    %2 = arith.cmpi ne, %1, %c0_i32_0 : i32
    scf.if %2 {
      %c0_21 = arith.constant 0 : index
      %c0_22 = arith.constant 0 : index
      %46 = vector.load %arg3[%c0_21, %c0_22] : memref<8x128xf32, #tpu.memory_space<vmem>>, vector<8x128xf32>
      %c0_23 = arith.constant 0 : index
      %c128_24 = arith.constant 128 : index
      %47 = vector.load %arg8[%c0_23, %c128_24] : memref<8x256xf32, #tpu.memory_space<vmem>>, vector<8x128xf32>
      tpu.vector_store %arg8[%c0_23, %c128_24], %46 {strides = array<i32>} : memref<8x256xf32, #tpu.memory_space<vmem>>, vector<8x128xf32>,
      %c0_25 = arith.constant 0 : index
      %c0_26 = arith.constant 0 : index
      %48 = vector.load %arg4[%c0_25, %c0_26] : memref<8x128xf32, #tpu.memory_space<vmem>>, vector<8x128xf32>
      %c0_27 = arith.constant 0 : index
      %c0_28 = arith.constant 0 : index
      %49 = vector.load %arg9[%c0_27, %c0_28] : memref<8x128xf32, #tpu.memory_space<vmem>>, vector<8x128xf32>
      tpu.vector_store %arg9[%c0_27, %c0_28], %48 {strides = array<i32>} : memref<8x128xf32, #tpu.memory_space<vmem>>, vector<8x128xf32>,
    } else {
    }
    %c0_i32_1 = arith.constant 0 : i32
    %3 = arith.index_cast %c0_i32_1 : i32 to index
    %c0 = arith.constant 0 : index
    %c0_2 = arith.constant 0 : index
    %4 = vector.load %arg2[%3, %c0, %c0_2] : memref<1x8x128xf32, #tpu.memory_space<vmem>>, vector<1x8x128xf32>
    %5 = vector.shape_cast %4 : vector<1x8x128xf32> to vector<8x128xf32>
    %c0_3 = arith.constant 0 : index
    %c0_4 = arith.constant 0 : index
    %6 = vector.load %arg8[%c0_3, %c0_4] : memref<8x256xf32, #tpu.memory_space<vmem>>, vector<8x128xf32>
    tpu.vector_store %arg8[%c0_3, %c0_4], %5 {strides = array<i32>} : memref<8x256xf32, #tpu.memory_space<vmem>>, vector<8x128xf32>,
    %c0_5 = arith.constant 0 : index
    %c0_6 = arith.constant 0 : index
    %7 = vector.load %arg8[%c0_5, %c0_6] : memref<8x256xf32, #tpu.memory_space<vmem>>, vector<8x256xf32>
    %c0_7 = arith.constant 0 : index
    %c0_8 = arith.constant 0 : index
    %8 = vector.load %arg5[%c0_7, %c0_8] : memref<256x512xf32, #tpu.memory_space<vmem>>, vector<256x512xf32>
    %cst = arith.constant dense<0.000000e+00> : vector<8x512xf32>
    %9 = tpu.matmul %7, %8, %cst {dimension_numbers = #tpu.dot_dimension_numbers<[1], [0], [0], [1], [0, 0, 1, 1], [], []>} : vector<8x256xf32>, vector<256x512xf32>, vector<8x512xf32> -> vector<8x512xf32>
    %10 = vector.extract_strided_slice %9 {offsets = [0, 0], sizes = [8, 128], strides = [1, 1]} : vector<8x512xf32> to vector<8x128xf32>
    %11 = arith.negf %10 : vector<8x128xf32>
    %12 = math.exp %11 : vector<8x128xf32>
    %cst_9 = arith.constant 1.000000e+00 : f32
    %13 = vector.broadcast %cst_9 : f32 to vector<8x128xf32>
    %14 = arith.addf %13, %12 : vector<8x128xf32>
    %15 = arith.divf %13, %14 : vector<8x128xf32>
    %16 = vector.extract_strided_slice %9 {offsets = [0, 128], sizes = [8, 128], strides = [1, 1]} : vector<8x512xf32> to vector<8x128xf32>
    %17 = arith.negf %16 : vector<8x128xf32>
    %18 = math.exp %17 : vector<8x128xf32>
    %cst_10 = arith.constant 1.000000e+00 : f32
    %19 = vector.broadcast %cst_10 : f32 to vector<8x128xf32>
    %20 = arith.addf %19, %18 : vector<8x128xf32>
    %21 = arith.divf %19, %20 : vector<8x128xf32>
    %22 = vector.extract_strided_slice %9 {offsets = [0, 256], sizes = [8, 128], strides = [1, 1]} : vector<8x512xf32> to vector<8x128xf32>
    %23 = math.tanh %22 : vector<8x128xf32>
    %24 = vector.extract_strided_slice %9 {offsets = [0, 384], sizes = [8, 128], strides = [1, 1]} : vector<8x512xf32> to vector<8x128xf32>
    %25 = arith.negf %24 : vector<8x128xf32>
    %26 = math.exp %25 : vector<8x128xf32>
    %cst_11 = arith.constant 1.000000e+00 : f32
    %27 = vector.broadcast %cst_11 : f32 to vector<8x128xf32>
    %28 = arith.addf %27, %26 : vector<8x128xf32>
    %29 = arith.divf %27, %28 : vector<8x128xf32>
    %c0_12 = arith.constant 0 : index
    %c0_13 = arith.constant 0 : index
    %30 = vector.load %arg9[%c0_12, %c0_13] : memref<8x128xf32, #tpu.memory_space<vmem>>, vector<8x128xf32>
    %31 = arith.mulf %21, %30 : vector<8x128xf32>
    %32 = arith.mulf %15, %23 : vector<8x128xf32>
    %33 = arith.addf %31, %32 : vector<8x128xf32>
    %34 = math.tanh %33 : vector<8x128xf32>
    %35 = arith.mulf %29, %34 : vector<8x128xf32>
    %c0_14 = arith.constant 0 : index
    %c0_15 = arith.constant 0 : index
    %36 = vector.load %arg9[%c0_14, %c0_15] : memref<8x128xf32, #tpu.memory_space<vmem>>, vector<8x128xf32>
    tpu.vector_store %arg9[%c0_14, %c0_15], %33 {strides = array<i32>} : memref<8x128xf32, #tpu.memory_space<vmem>>, vector<8x128xf32>,
    %c0_16 = arith.constant 0 : index
    %c128 = arith.constant 128 : index
    %37 = vector.load %arg8[%c0_16, %c128] : memref<8x256xf32, #tpu.memory_space<vmem>>, vector<8x128xf32>
    tpu.vector_store %arg8[%c0_16, %c128], %35 {strides = array<i32>} : memref<8x256xf32, #tpu.memory_space<vmem>>, vector<8x128xf32>,
    %38 = arith.index_cast %c0_i32_1 : i32 to index
    %c0_17 = arith.constant 0 : index
    %c0_18 = arith.constant 0 : index
    %39 = vector.load %arg6[%38, %c0_17, %c0_18] : memref<1x8x128xf32, #tpu.memory_space<vmem>>, vector<1x8x128xf32>
    %40 = vector.shape_cast %39 : vector<1x8x128xf32> to vector<8x128xf32>
    %41 = vector.shape_cast %35 : vector<8x128xf32> to vector<1x8x128xf32>
    tpu.vector_store %arg6[%38, %c0_17, %c0_18], %41 {strides = array<i32>} : memref<1x8x128xf32, #tpu.memory_space<vmem>>, vector<1x8x128xf32>,
    %42 = arith.index_cast %c0_i32_1 : i32 to index
    %c0_19 = arith.constant 0 : index
    %c0_20 = arith.constant 0 : index
    %43 = vector.load %arg7[%42, %c0_19, %c0_20] : memref<1x8x128xf32, #tpu.memory_space<vmem>>, vector<1x8x128xf32>
    %44 = vector.shape_cast %43 : vector<1x8x128xf32> to vector<8x128xf32>
    %45 = vector.shape_cast %33 : vector<8x128xf32> to vector<1x8x128xf32>
    tpu.vector_store %arg7[%42, %c0_19, %c0_20], %45 {strides = array<i32>} : memref<1x8x128xf32, #tpu.memory_space<vmem>>, vector<1x8x128xf32>,
    %c1_i32 = arith.constant 1 : i32
    return
  }
  func.func @transform_0(%arg0: i32, %arg1: i32) -> (i32, i32, i32) {
    %c0_i32 = arith.constant 0 : i32
    %c0_i32_0 = arith.constant 0 : i32
    return %arg1, %arg0, %c0_i32 : i32, i32, i32
  }
  func.func @transform_1(%arg0: i32, %arg1: i32) -> (i32, i32) {
    %c0_i32 = arith.constant 0 : i32
    %c0_i32_0 = arith.constant 0 : i32
    return %arg0, %c0_i32 : i32, i32
  }
  func.func @transform_2(%arg0: i32, %arg1: i32) -> (i32, i32) {
    %c0_i32 = arith.constant 0 : i32
    %c0_i32_0 = arith.constant 0 : i32
    return %arg0, %c0_i32 : i32, i32
  }
  func.func @transform_3(%arg0: i32, %arg1: i32) -> (i32, i32) {
    %c0_i32 = arith.constant 0 : i32
    %c0_i32_0 = arith.constant 0 : i32
    %c0_i32_1 = arith.constant 0 : i32
    return %c0_i32, %c0_i32_0 : i32, i32
  }
  func.func @transform_4(%arg0: i32, %arg1: i32) -> (i32, i32, i32) {
    %c0_i32 = arith.constant 0 : i32
    %c0_i32_0 = arith.constant 0 : i32
    return %arg1, %arg0, %c0_i32 : i32, i32, i32
  }
  func.func @transform_5(%arg0: i32, %arg1: i32) -> (i32, i32, i32) {
    %c0_i32 = arith.constant 0 : i32
    %c0_i32_0 = arith.constant 0 : i32
    return %arg1, %arg0, %c0_i32 : i32, i32, i32
  }
}

</mosaic_0001>

<bundles_post_ra>
// kernel: tpu_custom_call.1
= control target key start
LH: loop header
LB: loop body
LE: loop exit
PB: predicated region body
PF: predicated region fallthrough
CT: control target
= control target key end

     0   :  { %11 = vsyncpa [#allocation5], 0  ;;  %s736_s0 = inlined_call_operand.hbm [shape: f32[1,8,128], index: 0, kind: input, shape index: {}]   ;;  %s737_s1 = inlined_call_operand.hbm [shape: f32[8,128], index: 1, kind: input, shape index: {}]   ;;  %s738_s2 = inlined_call_operand.hbm [shape: f32[8,128], index: 2, kind: input, shape index: {}]   ;;  %s739_s3 = inlined_call_operand.hbm [shape: f32[256,512], index: 3, kind: input, shape index: {}]   ;;  %s740_s4 = inlined_call_operand.hbm [shape: f32[1,8,128], index: 4, kind: output, shape index: {0}]   ;;  %s741_s5 = inlined_call_operand.hbm [shape: f32[1,8,128], index: 5, kind: output, shape index: {1}]  }
   0x1   :  { %12 = vsyncpa [#allocation8], 0 }
   0x2   :  { %13 = vsyncpa [#allocation11], 0 }
   0x3   :  { %14 = vsyncpa [#allocation6], 0  ;;  %s32_s20 = sshll.u32 %s737_s1, 4  ;;  %s33_s20 = int_to_ptr.hbm [resolvable:$true] %s32_s20 }
   0x4   :  { %15 = vsyncpa [#allocation14], 0  ;;  %s662_s21 = smov [#allocation7]   ;;  %s21_s25 = sshll.u32 %s736_s0, 4  ;;  %s22_s25 = int_to_ptr.hbm [resolvable:$true] %s21_s25 }
   0x5   :  { %s34_s22 = sshll.u32 %s662_s21, 4  ;;  %s663_s26 = smov [#allocation4]   ;;  %s35_s22 = int_to_ptr.vmem [resolvable:$true] %s34_s22 }
   0x6   :  { %37 = dma.hbm_to_vmem [thread:$0]  %s33_s20, 128, %s35_s22, [#allocation8]  }
   0x7   :  { %s23_s27 = sshll.u32 %s663_s26, 4  ;;  %s43_s30 = sshll.u32 %s738_s2, 4  ;;  %s24_s27 = int_to_ptr.vmem [resolvable:$true] %s23_s27  ;;  %s44_s30 = int_to_ptr.hbm [resolvable:$true] %s43_s30 }
   0x8   :  { %26 = dma.hbm_to_vmem [thread:$0]  %s22_s25, 128, %s24_s27, [#allocation5]  }
   0x9   :  { %s53_s7 = sshll.u32 %s739_s3, 4  ;;  %s664_s8 = smov [#allocation9]   ;;  %s54_s7 = int_to_ptr.hbm [resolvable:$true] %s53_s7 }
   0xa   :  { %s45_s9 = sshll.u32 %s664_s8, 4  ;;  %s665_s0 = smov [#allocation10]   ;;  %s46_s9 = int_to_ptr.vmem [resolvable:$true] %s45_s9 }
   0xb   :  { %48 = dma.hbm_to_vmem [thread:$0]  %s44_s30, 128, %s46_s9, [#allocation8]  }
   0xc   :  { %s55_s10 = sshll.u32 %s665_s0, 4  ;;  %s666_s11 = smov 512   ;;  %s56_s10 = int_to_ptr.vmem [resolvable:$true] %s55_s10 }
   0xd   :  { %s667_s12 = smov 32  }
   0xe   :  { %61 = dma.hbm_to_vmem [thread:$0]  %s54_s7, 16384, %s56_s10, [#allocation11], %s666_s11, %s666_s11, %s667_s12  }
   0xf   :  { %652 = dma.done.wait [#allocation5], 128  }
  0x10   :  { %653 = vsyncadd [#allocation5], 4294967168 }
  0x11   :  { %654 = dma.done.wait [#allocation8], 256  }
  0x12   :  { %655 = vsyncadd [#allocation8], 4294967040 }
  0x13   :  { %656 = dma.done.wait [#allocation11], 16384  }
  0x14   :  { %657 = vsyncadd [#allocation11], 4294950912  ;;  %v151_v0 = vld [vmem:[#allocation10 + $0x1e8] sm:$0xff]  ;;  %v150_v4 = vld [vmem:[#allocation10 + $0x1e0] sm:$0xff]  ;;  %s668_s2 = smov [#allocation13]   ;;  %s464_s15 = sshll.u32 %s741_s5, 4  ;;  %s465_s15 = int_to_ptr.hbm [resolvable:$true] %s464_s15 }
  0x15   :  { %v215_v1 = vld [vmem:[#allocation10 + $0x3e8] sm:$0xff]  ;;  %258 = vmatpush.msra.mxu2 %v151_v0  ;;  %v214_v5 = vld [vmem:[#allocation10 + $0x3e0] sm:$0xff]  ;;  %218 = vmatpush.msra.mxu0 %v150_v4  ;;  %v153_v62 = vld [vmem:[#allocation10 + $0x1f8] sm:$0xff]  ;;  %s462_s3 = sshll.u32 %s668_s2, 4  ;;  %s669_s5 = smov [#allocation12]   ;;  %s463_s3 = int_to_ptr.vmem [resolvable:$true] %s462_s3 }
  0x16   :  { %v147_v2 = vld [vmem:[#allocation10 + $0x1c8] sm:$0xff]  ;;  %278 = vmatpush.msra.mxu3 %v215_v1  ;;  %238 = vmatpush.msra.mxu1 %v214_v5  ;;  %v146_v8 = vld [vmem:[#allocation10 + $0x1c0] sm:$0xff]  ;;  %v217_v63 = vld [vmem:[#allocation10 + $0x3f8] sm:$0xff]  ;;  %s451_s16 = sshll.u32 %s669_s5, 4  ;;  %s453_s19 = sshll.u32 %s740_s4, 4  ;;  %s452_s16 = int_to_ptr.vmem [resolvable:$true] %s451_s16  ;;  %s454_s19 = int_to_ptr.hbm [resolvable:$true] %s453_s19 }
  0x17   :  { %v211_v3 = vld [vmem:[#allocation10 + $0x3c8] sm:$0xff]  ;;  %259 = vmatpush.msra.mxu2 %v147_v2  ;;  %v210_v9 = vld [vmem:[#allocation10 + $0x3c0] sm:$0xff]  ;;  %219 = vmatpush.msra.mxu0 %v146_v8  ;;  %v149_v2 = vld [vmem:[#allocation10 + $0x1d8] sm:$0xff] }
  0x18   :  { %v143_v6 = vld [vmem:[#allocation10 + $0x1a8] sm:$0xff]  ;;  %279 = vmatpush.msra.mxu3 %v211_v3  ;;  %239 = vmatpush.msra.mxu1 %v210_v9  ;;  %v142_v12 = vld [vmem:[#allocation10 + $0x1a0] sm:$0xff]  ;;  %v213_v3 = vld [vmem:[#allocation10 + $0x3d8] sm:$0xff] }
  0x19   :  { %v207_v7 = vld [vmem:[#allocation10 + $0x3a8] sm:$0xff]  ;;  %v206_v13 = vld [vmem:[#allocation10 + $0x3a0] sm:$0xff]  ;;  %260 = vmatpush.msra.mxu2 %v143_v6  ;;  %220 = vmatpush.msra.mxu0 %v142_v12  ;;  %v152_v4 = vld [vmem:[#allocation10 + $0x1f0] sm:$0xff] }
  0x1a   :  { %v139_v10 = vld [vmem:[#allocation10 + $0x188] sm:$0xff]  ;;  %280 = vmatpush.msra.mxu3 %v207_v7  ;;  %v138_v14 = vld [vmem:[#allocation10 + $0x180] sm:$0xff]  ;;  %240 = vmatpush.msra.mxu1 %v206_v13  ;;  %v216_v5 = vld [vmem:[#allocation10 + $0x3f0] sm:$0xff] }
  0x1b   :  { %v203_v11 = vld [vmem:[#allocation10 + $0x388] sm:$0xff]  ;;  %v202_v15 = vld [vmem:[#allocation10 + $0x380] sm:$0xff]  ;;  %261 = vmatpush.msra.mxu2 %v139_v10  ;;  %221 = vmatpush.msra.mxu0 %v138_v14  ;;  %v145_v6 = vld [vmem:[#allocation10 + $0x1b8] sm:$0xff] }
  0x1c   :  { %v135_v16 = vld [vmem:[#allocation10 + $0x168] sm:$0xff]  ;;  %281 = vmatpush.msra.mxu3 %v203_v11  ;;  %v134_v18 = vld [vmem:[#allocation10 + $0x160] sm:$0xff]  ;;  %241 = vmatpush.msra.mxu1 %v202_v15  ;;  %v209_v7 = vld [vmem:[#allocation10 + $0x3b8] sm:$0xff] }
  0x1d   :  { %v199_v17 = vld [vmem:[#allocation10 + $0x368] sm:$0xff]  ;;  %v198_v19 = vld [vmem:[#allocation10 + $0x360] sm:$0xff]  ;;  %262 = vmatpush.msra.mxu2 %v135_v16  ;;  %222 = vmatpush.msra.mxu0 %v134_v18  ;;  %v148_v8 = vld [vmem:[#allocation10 + $0x1d0] sm:$0xff] }
  0x1e   :  { %v131_v20 = vld [vmem:[#allocation10 + $0x148] sm:$0xff]  ;;  %282 = vmatpush.msra.mxu3 %v199_v17  ;;  %v130_v22 = vld [vmem:[#allocation10 + $0x140] sm:$0xff]  ;;  %242 = vmatpush.msra.mxu1 %v198_v19  ;;  %v212_v9 = vld [vmem:[#allocation10 + $0x3d0] sm:$0xff] }
  0x1f   :  { %v195_v21 = vld [vmem:[#allocation10 + $0x348] sm:$0xff]  ;;  %v194_v23 = vld [vmem:[#allocation10 + $0x340] sm:$0xff]  ;;  %263 = vmatpush.msra.mxu2 %v131_v20  ;;  %223 = vmatpush.msra.mxu0 %v130_v22  ;;  %v141_v10 = vld [vmem:[#allocation10 + $0x198] sm:$0xff] }
  0x20   :  { %v127_v24 = vld [vmem:[#allocation10 + $0x128] sm:$0xff]  ;;  %283 = vmatpush.msra.mxu3 %v195_v21  ;;  %v126_v26 = vld [vmem:[#allocation10 + $0x120] sm:$0xff]  ;;  %243 = vmatpush.msra.mxu1 %v194_v23  ;;  %v205_v11 = vld [vmem:[#allocation10 + $0x398] sm:$0xff] }
  0x21   :  { %v191_v25 = vld [vmem:[#allocation10 + $0x328] sm:$0xff]  ;;  %v190_v27 = vld [vmem:[#allocation10 + $0x320] sm:$0xff]  ;;  %264 = vmatpush.msra.mxu2 %v127_v24  ;;  %224 = vmatpush.msra.mxu0 %v126_v26  ;;  %v714_v13 = vld [vmem:[#allocation7] sm:$0xff] }
  0x22   :  { %v123_v28 = vld [vmem:[#allocation10 + $0x108] sm:$0xff]  ;;  %284 = vmatpush.msra.mxu3 %v191_v25  ;;  %v122_v30 = vld [vmem:[#allocation10 + $0x100] sm:$0xff]  ;;  %244 = vmatpush.msra.mxu1 %v190_v27  ;;  %v144_v14 = vld [vmem:[#allocation10 + $0x1b0] sm:$0xff] }
  0x23   :  { %v187_v29 = vld [vmem:[#allocation10 + $0x308] sm:$0xff]  ;;  %v186_v31 = vld [vmem:[#allocation10 + $0x300] sm:$0xff]  ;;  %265 = vmatpush.msra.mxu2 %v123_v28  ;;  %225 = vmatpush.msra.mxu0 %v122_v30  ;;  %v208_v15 = vld [vmem:[#allocation10 + $0x3b0] sm:$0xff] }
  0x24   :  { %v119_v32 = vld [vmem:[#allocation10 + $0xe8] sm:$0xff]  ;;  %285 = vmatpush.msra.mxu3 %v187_v29  ;;  %v118_v34 = vld [vmem:[#allocation10 + $0xe0] sm:$0xff]  ;;  %245 = vmatpush.msra.mxu1 %v186_v31  ;;  %v137_v16 = vld [vmem:[#allocation10 + $0x178] sm:$0xff] }
  0x25   :  { %v183_v33 = vld [vmem:[#allocation10 + $0x2e8] sm:$0xff]  ;;  %v182_v35 = vld [vmem:[#allocation10 + $0x2e0] sm:$0xff]  ;;  %266 = vmatpush.msra.mxu2 %v119_v32  ;;  %226 = vmatpush.msra.mxu0 %v118_v34  ;;  %v201_v17 = vld [vmem:[#allocation10 + $0x378] sm:$0xff] }
  0x26   :  { %v115_v36 = vld [vmem:[#allocation10 + $0xc8] sm:$0xff]  ;;  %286 = vmatpush.msra.mxu3 %v183_v33  ;;  %v114_v38 = vld [vmem:[#allocation10 + $0xc0] sm:$0xff]  ;;  %246 = vmatpush.msra.mxu1 %v182_v35  ;;  %v140_v18 = vld [vmem:[#allocation10 + $0x190] sm:$0xff] }
  0x27   :  { %v179_v37 = vld [vmem:[#allocation10 + $0x2c8] sm:$0xff]  ;;  %v178_v39 = vld [vmem:[#allocation10 + $0x2c0] sm:$0xff]  ;;  %267 = vmatpush.msra.mxu2 %v115_v36  ;;  %227 = vmatpush.msra.mxu0 %v114_v38  ;;  %v204_v19 = vld [vmem:[#allocation10 + $0x390] sm:$0xff] }
  0x28   :  { %v111_v40 = vld [vmem:[#allocation10 + $0xa8] sm:$0xff]  ;;  %287 = vmatpush.msra.mxu3 %v179_v37  ;;  %v110_v42 = vld [vmem:[#allocation10 + $0xa0] sm:$0xff]  ;;  %247 = vmatpush.msra.mxu1 %v178_v39  ;;  %v133_v20 = vld [vmem:[#allocation10 + $0x158] sm:$0xff] }
  0x29   :  { %v175_v41 = vld [vmem:[#allocation10 + $0x2a8] sm:$0xff]  ;;  %v174_v43 = vld [vmem:[#allocation10 + $0x2a0] sm:$0xff]  ;;  %268 = vmatpush.msra.mxu2 %v111_v40  ;;  %228 = vmatpush.msra.mxu0 %v110_v42  ;;  %v197_v21 = vld [vmem:[#allocation10 + $0x358] sm:$0xff] }
  0x2a   :  { %v107_v44 = vld [vmem:[#allocation10 + $0x88] sm:$0xff]  ;;  %288 = vmatpush.msra.mxu3 %v175_v41  ;;  %v106_v46 = vld [vmem:[#allocation10 + $0x80] sm:$0xff]  ;;  %248 = vmatpush.msra.mxu1 %v174_v43  ;;  %v136_v22 = vld [vmem:[#allocation10 + $0x170] sm:$0xff] }
  0x2b   :  { %v171_v45 = vld [vmem:[#allocation10 + $0x288] sm:$0xff]  ;;  %v170_v47 = vld [vmem:[#allocation10 + $0x280] sm:$0xff]  ;;  %269 = vmatpush.msra.mxu2 %v107_v44  ;;  %229 = vmatpush.msra.mxu0 %v106_v46  ;;  %v200_v23 = vld [vmem:[#allocation10 + $0x370] sm:$0xff] }
  0x2c   :  { %v103_v48 = vld [vmem:[#allocation10 + $0x68] sm:$0xff]  ;;  %289 = vmatpush.msra.mxu3 %v171_v45  ;;  %v102_v50 = vld [vmem:[#allocation10 + $0x60] sm:$0xff]  ;;  %249 = vmatpush.msra.mxu1 %v170_v47  ;;  %v129_v24 = vld [vmem:[#allocation10 + $0x138] sm:$0xff] }
  0x2d   :  { %v167_v49 = vld [vmem:[#allocation10 + $0x268] sm:$0xff]  ;;  %v166_v51 = vld [vmem:[#allocation10 + $0x260] sm:$0xff]  ;;  %270 = vmatpush.msra.mxu2 %v103_v48  ;;  %230 = vmatpush.msra.mxu0 %v102_v50  ;;  %v193_v25 = vld [vmem:[#allocation10 + $0x338] sm:$0xff] }
  0x2e   :  { %v99_v52 = vld [vmem:[#allocation10 + $0x48] sm:$0xff]  ;;  %290 = vmatpush.msra.mxu3 %v167_v49  ;;  %v98_v54 = vld [vmem:[#allocation10 + $0x40] sm:$0xff]  ;;  %250 = vmatpush.msra.mxu1 %v166_v51  ;;  %v132_v26 = vld [vmem:[#allocation10 + $0x150] sm:$0xff] }
  0x2f   :  { %v163_v53 = vld [vmem:[#allocation10 + $0x248] sm:$0xff]  ;;  %v162_v55 = vld [vmem:[#allocation10 + $0x240] sm:$0xff]  ;;  %271 = vmatpush.msra.mxu2 %v99_v52  ;;  %231 = vmatpush.msra.mxu0 %v98_v54  ;;  %v196_v27 = vld [vmem:[#allocation10 + $0x350] sm:$0xff] }
  0x30   :  { %v95_v56 = vld [vmem:[#allocation10 + $0x28] sm:$0xff]  ;;  %291 = vmatpush.msra.mxu3 %v163_v53  ;;  %v94_v58 = vld [vmem:[#allocation10 + $0x20] sm:$0xff]  ;;  %251 = vmatpush.msra.mxu1 %v162_v55  ;;  %v125_v28 = vld [vmem:[#allocation10 + $0x118] sm:$0xff] }
  0x31   :  { %v159_v57 = vld [vmem:[#allocation10 + $0x228] sm:$0xff]  ;;  %v158_v59 = vld [vmem:[#allocation10 + $0x220] sm:$0xff]  ;;  %272 = vmatpush.msra.mxu2 %v95_v56  ;;  %232 = vmatpush.msra.mxu0 %v94_v58  ;;  %v189_v29 = vld [vmem:[#allocation10 + $0x318] sm:$0xff] }
  0x32   :  { %v91_v60 = vld [vmem:[#allocation10 + $0x8] sm:$0xff]  ;;  %292 = vmatpush.msra.mxu3 %v159_v57  ;;  %252 = vmatpush.msra.mxu1 %v158_v59  ;;  %v90_v0 = vld [vmem:[#allocation10] sm:$0xff]  ;;  %v128_v30 = vld [vmem:[#allocation10 + $0x130] sm:$0xff] }
  0x33   :  { %v155_v61 = vld [vmem:[#allocation10 + $0x208] sm:$0xff]  ;;  %v154_v1 = vld [vmem:[#allocation10 + $0x200] sm:$0xff]  ;;  %273 = vmatpush.msra.mxu2 %v91_v60  ;;  %233 = vmatpush.msra.mxu0 %v90_v0  ;;  %v192_v31 = vld [vmem:[#allocation10 + $0x330] sm:$0xff] }
  0x34   :  { %293 = vmatpush.msra.mxu3 %v155_v61  ;;  %253 = vmatpush.msra.mxu1 %v154_v1  ;;  %v712_v12 = vld [vmem:[#allocation4] sm:$0xff]  ;;  %v121_v32 = vld [vmem:[#allocation10 + $0xf8] sm:$0xff]  ;;  %v124_v34 = vld [vmem:[#allocation10 + $0x110] sm:$0xff] }
  0x35   :  { %338 = vmatpush.msrb.mxu2 %v153_v62  ;;  %298 = vmatpush.msrb.mxu0 %v152_v4  ;;  %v185_v33 = vld [vmem:[#allocation10 + $0x2f8] sm:$0xff]  ;;  %v188_v35 = vld [vmem:[#allocation10 + $0x310] sm:$0xff] }
  0x36   :  { %358 = vmatpush.msrb.mxu3 %v217_v63  ;;  %318 = vmatpush.msrb.mxu1 %v216_v5  ;;  %v117_v36 = vld [vmem:[#allocation10 + $0xd8] sm:$0xff]  ;;  %v120_v38 = vld [vmem:[#allocation10 + $0xf0] sm:$0xff] }
  0x37   :  { %339 = vmatpush.msrb.mxu2 %v149_v2  ;;  %299 = vmatpush.msrb.mxu0 %v148_v8  ;;  %v181_v37 = vld [vmem:[#allocation10 + $0x2d8] sm:$0xff]  ;;  %v184_v39 = vld [vmem:[#allocation10 + $0x2f0] sm:$0xff] }
  0x38   :  { %359 = vmatpush.msrb.mxu3 %v213_v3  ;;  %319 = vmatpush.msrb.mxu1 %v212_v9  ;;  %v113_v40 = vld [vmem:[#allocation10 + $0xb8] sm:$0xff]  ;;  %v116_v42 = vld [vmem:[#allocation10 + $0xd0] sm:$0xff] }
  0x39   :  { %340 = vmatpush.msrb.mxu2 %v145_v6  ;;  %294 = vmatmul.f32.vlgmr.msra.gmra.mxu3 %v714_v13  ;;  %v177_v41 = vld [vmem:[#allocation10 + $0x2b8] sm:$0xff]  ;;  %v180_v43 = vld [vmem:[#allocation10 + $0x2d0] sm:$0xff] }
  0x3a   :  { %360 = vmatpush.msrb.mxu3 %v209_v7  ;;  %274 = vmatmul.f32.vlgmr.msra.gmra.mxu2 %v712_v12  ;;  %v109_v44 = vld [vmem:[#allocation10 + $0x98] sm:$0xff]  ;;  %v112_v46 = vld [vmem:[#allocation10 + $0xb0] sm:$0xff] }
  0x3b   :  { %341 = vmatpush.msrb.mxu2 %v141_v10  ;;  %300 = vmatpush.msrb.mxu0 %v144_v14  ;;  %v173_v45 = vld [vmem:[#allocation10 + $0x298] sm:$0xff]  ;;  %v176_v47 = vld [vmem:[#allocation10 + $0x2b0] sm:$0xff] }
  0x3c   :  { %361 = vmatpush.msrb.mxu3 %v205_v11  ;;  %320 = vmatpush.msrb.mxu1 %v208_v15  ;;  %v105_v48 = vld [vmem:[#allocation10 + $0x78] sm:$0xff]  ;;  %v108_v50 = vld [vmem:[#allocation10 + $0x90] sm:$0xff] }
  0x3d   :  { %342 = vmatpush.msrb.mxu2 %v137_v16  ;;  %301 = vmatpush.msrb.mxu0 %v140_v18  ;;  %v169_v49 = vld [vmem:[#allocation10 + $0x278] sm:$0xff]  ;;  %v172_v51 = vld [vmem:[#allocation10 + $0x290] sm:$0xff] }
  0x3e   :  { %362 = vmatpush.msrb.mxu3 %v201_v17  ;;  %321 = vmatpush.msrb.mxu1 %v204_v19  ;;  %v101_v52 = vld [vmem:[#allocation10 + $0x58] sm:$0xff]  ;;  %v104_v54 = vld [vmem:[#allocation10 + $0x70] sm:$0xff] }
  0x3f   :  { %343 = vmatpush.msrb.mxu2 %v133_v20  ;;  %302 = vmatpush.msrb.mxu0 %v136_v22  ;;  %v165_v53 = vld [vmem:[#allocation10 + $0x258] sm:$0xff]  ;;  %v168_v55 = vld [vmem:[#allocation10 + $0x270] sm:$0xff] }
  0x40   :  { %363 = vmatpush.msrb.mxu3 %v197_v21  ;;  %322 = vmatpush.msrb.mxu1 %v200_v23  ;;  %v97_v56 = vld [vmem:[#allocation10 + $0x38] sm:$0xff]  ;;  %v100_v58 = vld [vmem:[#allocation10 + $0x50] sm:$0xff] }
  0x41   :  { %344 = vmatpush.msrb.mxu2 %v129_v24  ;;  %234 = vmatmul.f32.vlgmr.msra.gmra.mxu0 %v712_v12  ;;  %v161_v57 = vld [vmem:[#allocation10 + $0x238] sm:$0xff]  ;;  %v164_v59 = vld [vmem:[#allocation10 + $0x250] sm:$0xff] }
  0x42   :  { %364 = vmatpush.msrb.mxu3 %v193_v25  ;;  %254 = vmatmul.f32.vlgmr.msra.gmra.mxu1 %v714_v13  ;;  %v93_v60 = vld [vmem:[#allocation10 + $0x18] sm:$0xff]  ;;  %v96_v62 = vld [vmem:[#allocation10 + $0x30] sm:$0xff] }
  0x43   :  { %303 = vmatpush.msrb.mxu0 %v132_v26  ;;  %323 = vmatpush.msrb.mxu1 %v196_v27  ;;  %v157_v61 = vld [vmem:[#allocation10 + $0x218] sm:$0xff]  ;;  %v160_v63 = vld [vmem:[#allocation10 + $0x230] sm:$0xff] }
  0x44   :  { %345 = vmatpush.msrb.mxu2 %v125_v28  ;;  %365 = vmatpush.msrb.mxu3 %v189_v29  ;;  %v92_v0 = vld [vmem:[#allocation10 + $0x10] sm:$0xff] }
  0x45   :  { %304 = vmatpush.msrb.mxu0 %v128_v30  ;;  %324 = vmatpush.msrb.mxu1 %v192_v31  ;;  %v156_v1 = vld [vmem:[#allocation10 + $0x210] sm:$0xff] }
  0x46   :  { %346 = vmatpush.msrb.mxu2 %v121_v32  ;;  %366 = vmatpush.msrb.mxu3 %v185_v33 }
  0x47   :  { %305 = vmatpush.msrb.mxu0 %v124_v34  ;;  %325 = vmatpush.msrb.mxu1 %v188_v35  ;;  %v84_v35 = vld [vmem:[#allocation9] sm:$0xff] }
  0x48   :  { %347 = vmatpush.msrb.mxu2 %v117_v36  ;;  %367 = vmatpush.msrb.mxu3 %v181_v37 }
  0x49   :  { %306 = vmatpush.msrb.mxu0 %v120_v38  ;;  %326 = vmatpush.msrb.mxu1 %v184_v39 }
  0x4a   :  { %348 = vmatpush.msrb.mxu2 %v113_v40  ;;  %368 = vmatpush.msrb.mxu3 %v177_v41 }
  0x4b   :  { %307 = vmatpush.msrb.mxu0 %v116_v42  ;;  %327 = vmatpush.msrb.mxu1 %v180_v43 }
  0x4c   :  { %349 = vmatpush.msrb.mxu2 %v109_v44  ;;  %369 = vmatpush.msrb.mxu3 %v173_v45 }
  0x4d   :  { %308 = vmatpush.msrb.mxu0 %v112_v46  ;;  %328 = vmatpush.msrb.mxu1 %v176_v47 }
  0x4e   :  { %350 = vmatpush.msrb.mxu2 %v105_v48  ;;  %370 = vmatpush.msrb.mxu3 %v169_v49 }
  0x4f   :  { %309 = vmatpush.msrb.mxu0 %v108_v50  ;;  %329 = vmatpush.msrb.mxu1 %v172_v51 }
  0x50   :  { %351 = vmatpush.msrb.mxu2 %v101_v52  ;;  %371 = vmatpush.msrb.mxu3 %v165_v53 }
  0x51   :  { %310 = vmatpush.msrb.mxu0 %v104_v54  ;;  %330 = vmatpush.msrb.mxu1 %v168_v55 }
  0x52   :  { %352 = vmatpush.msrb.mxu2 %v97_v56  ;;  %372 = vmatpush.msrb.mxu3 %v161_v57 }
  0x53   :  { %311 = vmatpush.msrb.mxu0 %v100_v58  ;;  %331 = vmatpush.msrb.mxu1 %v164_v59 }
  0x54   :  { %353 = vmatpush.msrb.mxu2 %v93_v60  ;;  %373 = vmatpush.msrb.mxu3 %v157_v61 }
  0x55   :  { %312 = vmatpush.msrb.mxu0 %v96_v62  ;;  %332 = vmatpush.msrb.mxu1 %v160_v63 }
  0x56   :  { %354 = vmatmul.f32.vlgmr.msrb.gmra.mxu2 %v712_v12  ;;  %374 = vmatmul.f32.vlgmr.msrb.gmra.mxu3 %v714_v13 }
  0x57   :  { %313 = vmatpush.msrb.mxu0 %v92_v0  ;;  %333 = vmatpush.msrb.mxu1 %v156_v1 }
  0x58   :  { %314 = vmatmul.f32.vlgmr.msrb.gmra.mxu0 %v712_v12  ;;  %334 = vmatmul.f32.vlgmr.msrb.gmra.mxu1 %v714_v13 }
  0xbc   :  { %v295_v3 = vpop.f32.mrf.mxu3 }
  0xbd   :  { %v275_v2 = vpop.f32.mrf.mxu2 }
  0xbe   :  { %v235_v4 = vpop.f32.mrf.mxu0  ;;  %v296_v6 = vadd.f32 %v295_v3, %v275_v2 }
  0xbf   :  { %v255_v5 = vpop.f32.mrf.mxu1 }
  0xc0   :  { %v256_v7 = vadd.f32 %v255_v5, %v235_v4  ;;  %v482_v8 = vmul.f32 -1.442695, %v296_v6 }
  0xc2   :  { %v481_v9 = vmul.f32 -1.442695, %v256_v7  ;;  %492 = vpow2.f32 %v482_v8 }
  0xc4   :  { %494 = vpow2.f32 %v481_v9 }
  0xc8   :  { %v493_v10 = vpop.eup %492 }
  0xc9   :  { %v400_v14 = vadd.f32 1.0, %v493_v10 }
  0xca   :  { %v495_v11 = vpop.eup %494 }
  0xcb   :  { %v381_v15 = vadd.f32 1.0, %v495_v11  ;;  %496 = vrcp.f32 %v400_v14  ;;  %vm406_vm0 = vweird.f32 %v400_v14  ;;  %v412_v18 = vand.u32 2147483648, %v400_v14 }
  0xcc   :  { %v410_v19 = vand.u32 2147483647, %v400_v14 }
  0xcd   :  { %498 = vrcp.f32 %v381_v15  ;;  %vm387_vm2 = vweird.f32 %v381_v15  ;;  %v393_v23 = vand.u32 2147483648, %v381_v15  ;;  %v391_v26 = vand.u32 2147483647, %v381_v15 }
  0xce   :  { %v413_v29 = vor.u32 1.1754944e-38, %v412_v18  ;;  %vm411_vm6 = vcmp.eq.f32.partialorder %v410_v19, 8.507059e+37 }
  0xcf   :  { %v394_v31 = vor.u32 1.1754944e-38, %v393_v23  ;;  %vm392_vm7 = vcmp.eq.f32.partialorder %v391_v26, 8.507059e+37 }
  0xd1   :  { %v497_v16 = vpop.eup %496 }
  0xd2   :  { %v402_v17 = vmul.f32 %v497_v16, %v400_v14  ;;  %vm407_vm1 = vweird.f32 %v497_v16 }
  0xd3   :  { %v499_v12 = vpop.eup %498  ;;  %vm724_vm4 = vmor %vm406_vm0, %vm407_vm1 }
  0xd4   :  { %v383_v13 = vmul.f32 %v499_v12, %v381_v15  ;;  %v403_v20 = vsub.f32 1.0, %v402_v17  ;;  %vm388_vm3 = vweird.f32 %v499_v12 }
  0xd5   :  { %v315_v21 = vpop.f32.mrf.mxu0  ;;  %v335_v22 = vpop.f32.mrf.mxu1  ;;  %vm389_vm5 = vmor %vm387_vm2, %vm388_vm3 }
  0xd6   :  { %v384_v24 = vsub.f32 1.0, %v383_v13  ;;  %v336_v25 = vadd.f32 %v335_v22, %v315_v21  ;;  %v404_v27 = vmul.f32 %v497_v16, %v403_v20 }
  0xd8   :  { %v385_v30 = vmul.f32 %v499_v12, %v384_v24  ;;  %500 = vtanh.f32 %v336_v25  ;;  %v405_v32 = vadd.f32 %v497_v16, %v404_v27 }
  0xd9   :  { %v355_v33 = vpop.f32.mrf.mxu2  ;;  %v375_v34 = vpop.f32.mrf.mxu3 }
  0xda   :  { %v386_v36 = vadd.f32 %v499_v12, %v385_v30  ;;  %v376_v37 = vadd.f32 %v375_v34, %v355_v33  ;;  %v409_v38 = vsel %vm724_vm4, %v497_v16, %v405_v32 }
  0xdb   :  { %v414_v40 = vsel %vm411_vm6, %v413_v29, %v409_v38 }
  0xdc   :  { %v390_v39 = vsel %vm389_vm5, %v499_v12, %v386_v36  ;;  %v483_v41 = vmul.f32 -1.442695, %v376_v37  ;;  %v437_v43 = vmul.f32 %v414_v40, %v84_v35 }
  0xdd   :  { %v395_v42 = vsel %vm392_vm7, %v394_v31, %v390_v39 }
  0xde   :  { %v501_v44 = vpop.eup %500  ;;  %502 = vpow2.f32 %v483_v41 }
  0xdf   :  { %v438_v45 = vmul.f32 %v501_v44, %v395_v42 }
  0xe1   :  { %v439_v46 = vadd.f32 %v438_v45, %v437_v43 }
  0xe3   :  { %445 = vst [vmem:[#allocation13] sm:$0xff] %v439_v46 }
  0xe4   :  { %v503_v47 = vpop.eup %502  ;;  %467 = dma.vmem_to_hbm [thread:$0]  %s463_s3, 128, %s465_s15, [#allocation14]  }
  0xe5   :  { %v420_v48 = vadd.f32 1.0, %v503_v47 }
  0xe7   :  { %504 = vrcp.f32 %v420_v48  ;;  %v432_v52 = vand.u32 2147483648, %v420_v48  ;;  %v430_v54 = vand.u32 2147483647, %v420_v48  ;;  %vm426_vm9 = vweird.f32 %v420_v48 }
  0xe8   :  { %506 = vtanh.f32 %v439_v46 }
  0xe9   :  { %v433_v56 = vor.u32 1.1754944e-38, %v432_v52  ;;  %vm431_vm11 = vcmp.eq.f32.partialorder %v430_v54, 8.507059e+37 }
  0xed   :  { %v505_v49 = vpop.eup %504 }
  0xee   :  { %v422_v50 = vmul.f32 %v505_v49, %v420_v48  ;;  %vm427_vm8 = vweird.f32 %v505_v49  ;;  %v507_v58 = vpop.eup %506 }
  0xef   :  { %vm428_vm10 = vmor %vm426_vm9, %vm427_vm8 }
  0xf0   :  { %v423_v51 = vsub.f32 1.0, %v422_v50 }
  0xf2   :  { %v424_v53 = vmul.f32 %v505_v49, %v423_v51 }
  0xf4   :  { %v425_v55 = vadd.f32 %v505_v49, %v424_v53 }
  0xf6   :  { %v429_v57 = vsel %vm428_vm10, %v505_v49, %v425_v55 }
  0xf7   :  { %v434_v59 = vsel %vm431_vm11, %v433_v56, %v429_v57 }
  0xf8   :  { %v441_v60 = vmul.f32 %v507_v58, %v434_v59 }
  0xfa   :  { %444 = vst [vmem:[#allocation12] sm:$0xff] %v441_v60 }
  0xfb   :  { %456 = dma.vmem_to_hbm [thread:$0]  %s452_s16, 128, %s454_s19, [#allocation6]  }
  0xfc   :  { %658 = dma.done.wait [#allocation6], 128  }
  0xfd   :  { %659 = vsyncadd [#allocation6], 4294967168 }
  0xfe   :  { %660 = dma.done.wait [#allocation14], 128  }
  0xff   :  { %661 = vsyncadd [#allocation14], 4294967168 }
 0x100   :  { %476 = vsyncpa [#allocation5], 1 }
 0x101   :  { %477 = vsyncpa [#allocation8], 1 }
 0x102   :  { %478 = vsyncpa [#allocation11], 1 }
 0x103   :  { %479 = vsyncpa [#allocation6], 1 }
 0x104   :  { %480 = vsyncpa [#allocation14], 1 }

</bundles_post_ra>
